<compile_context>
chip_gen: v6e
topology: v6e:2x2x1
jax: 0.10.0
libtpu: 0.0.40
codegen_flags: <defaults>
</compile_context>

<pallas_src>
import functools

import jax
import jax.numpy as jnp
from jax import lax
from jax.experimental import pallas as pl
from jax.experimental.pallas import tpu as pltpu

LRELU_SLOPE = 0.2
BN_EPS = 1e-5

# f32 = exact vs the PyTorch fp32 reference.  Set to jnp.bfloat16 on v6e/v7x once the
# batch is large enough that the matmuls are throughput-bound (review item).
MATMUL_DTYPE = jnp.float32

# Row map of the packed small-parameter slab (shape (16, 128), one lane-dense DMA).
_W1_ROWS = slice(0, 4)          # w1 (K=4, Cout=64) in lanes 0:64
_B1, _G1, _BT1 = 4, 5, 6        # lanes 0:64
_B2, _G2, _BT2, _B3 = 7, 8, 9, 10   # lanes 0:128
_L1B = 11                       # lanes 0:24
_L2W = 12                       # lanes 0:24  (second linear weight, as a row)
_L2B = 13                       # lane 0


# --------------------------------------------------------------------------
# The single fused kernel.
# --------------------------------------------------------------------------
def _disc_fused_kernel(x_ref, pslab_ref, w2_ref, w3_ref, l1w_ref,
                       out_ref, h1_scr, h2_scr, *, n_batch):
    f32 = jnp.float32
    N = n_batch

    def mm(a, b):
        return jnp.dot(a.astype(MATMUL_DTYPE), b.astype(MATMUL_DTYPE),
                       preferred_element_type=f32)

    def lrelu(v):
        return jnp.where(v > 0, v, LRELU_SLOPE * v)

    def batchnorm(v, g, b):
        # Training-mode batch statistics over (N, L) per channel, biased variance
        # (matches PyTorch BatchNorm1d forward when the module is not in eval()).
        cnt = v.shape[0]
        mean = jnp.sum(v, axis=0, keepdims=True) / cnt
        d = v - mean
        var = jnp.sum(d * d, axis=0, keepdims=True) / cnt
        return d * lax.rsqrt(var + BN_EPS) * g + b

    # ---- unpack the packed small-parameter slab (one DMA, sliced in-register) ------
    p = pslab_ref[...]                                  # (16, 128)
    w1 = p[_W1_ROWS, 0:64]                              # (4, 64)
    b1 = p[_B1:_B1 + 1, 0:64]
    g1 = p[_G1:_G1 + 1, 0:64]
    bt1 = p[_BT1:_BT1 + 1, 0:64]
    b2 = p[_B2:_B2 + 1, :]
    g2 = p[_G2:_G2 + 1, :]
    bt2 = p[_BT2:_BT2 + 1, :]
    b3 = p[_B3:_B3 + 1, :]
    l1b = p[_L1B:_L1B + 1, 0:24]
    l2w = p[_L2W:_L2W + 1, 0:24]
    l2b = p[_L2B:_L2B + 1, 0:1]

    # ---- stage 1: Conv1d(1->64,k4,s2,p1) + MaxPool(2,2) + LeakyReLU + BN(64) -------
    # x_ref holds host-side im2col taps: rows [0,16N) are the even conv positions,
    # rows [16N,32N) the odd ones -> one K=4 MXU matmul, then a row-half max.
    y = mm(x_ref[...], w1)                              # (32N, 64)
    p1 = jnp.maximum(y[:16 * N], y[16 * N:]) + b1       # fused MaxPool(2,2)
    h1 = batchnorm(lrelu(p1), g1, bt1)                  # (16N, 64)

    # ---- stage 2: Conv1d(64->128,k4,s2,p1) + MaxPool(2,2) + LeakyReLU + BN(128) ----
    # Pooled output m of batch n needs h1 rows 4m+off, off in {-1..2} (even conv pos)
    # and {1..4} (odd conv pos), zero at within-batch OOB.  Write h1 into a padded
    # scratch and pull each tap with a sublane-strided read; build one (8N,256)
    # im2col slab (4 taps on lanes, even/odd parities on sublanes) -> ONE matmul.
    PAD = 8
    h1_scr[0:PAD, :] = jnp.zeros((PAD, 64), f32)
    h1_scr[PAD + 16 * N:PAD + 16 * N + PAD, :] = jnp.zeros((PAD, 64), f32)
    h1_scr[PAD:PAD + 16 * N, :] = h1

    def h1_rows(off):                                   # rows 4j + off, j = 0..4N-1
        return h1_scr[pl.ds(PAD + off, 4 * N, stride=4), :]

    t_m1 = h1_rows(-1)
    t_0 = h1_rows(0)
    t_1 = h1_rows(1)
    t_2 = h1_rows(2)
    t_3 = h1_rows(3)
    t_4 = h1_rows(4)
    m_id = lax.broadcasted_iota(jnp.int32, (4 * N, 64), 0) % 4
    t_m1 = jnp.where(m_id == 0, 0.0, t_m1)              # within-batch row -1 -> 0
    t_4 = jnp.where(m_id == 3, 0.0, t_4)                # within-batch row 16 -> 0

    even_slab = jnp.concatenate([t_m1, t_0, t_1, t_2], axis=1)   # (4N, 256)
    odd_slab = jnp.concatenate([t_1, t_2, t_3, t_4], axis=1)     # (4N, 256)
    slab = jnp.concatenate([even_slab, odd_slab], axis=0)        # (8N, 256)

    c2 = mm(slab, w2_ref[...])                          # (8N, 128)
    p2 = jnp.maximum(c2[:4 * N], c2[4 * N:]) + b2       # fused MaxPool(2,2)
    h2 = batchnorm(lrelu(p2), g2, bt2)                  # (4N, 128)

    # ---- stage 3: Conv1d(128->128,k4,s1,p0): per-batch length 4 -> 1 ---------------
    # Fold the 4 rows of each batch into lanes (strided reads + 128-aligned concat)
    # and do ONE (N,512)x(512,128) matmul.
    h2_scr[...] = h2
    x3 = jnp.concatenate(
        [h2_scr[pl.ds(k, N, stride=4), :] for k in range(4)], axis=1)   # (N, 512)
    feat = mm(x3, w3_ref[...]) + b3                     # (N, 128) == x.squeeze()

    # ---- head: Linear(128->24) + Tanh + Linear(24->1) + Sigmoid --------------------
    t1 = jnp.tanh(mm(feat, l1w_ref[...]) + l1b)         # (N, 24)
    logit = jnp.sum(t1 * l2w, axis=1, keepdims=True) + l2b   # (N, 1), no matmul
    out_ref[...] = jax.nn.sigmoid(logit).astype(out_ref.dtype)


# --------------------------------------------------------------------------
# Wrapper: tiny XLA glue on the raw (N, 1, 64) input, then one pallas_call.
# --------------------------------------------------------------------------
def discriminator_forward(params, x):
    N, cin, L = x.shape
    assert cin == 1 and L == 64, "architecture requires input (N, 1, 64)"

    # conv1 padding=1, then im2col of the raw input only (128 floats / sample).
    # Even conv positions feeding each pooled output read xpad[4m+k], odd read
    # xpad[4m+2+k]; stack them on rows so the kernel does a single K=4 matmul.
    xpad = jnp.pad(x.reshape(N, L), ((0, 0), (1, 1)))            # (N, 66)
    xce = xpad[:, 0:L].reshape(N * (L // 4), 4)
    xco = xpad[:, 2:L + 2].reshape(N * (L // 4), 4)
    x_im2col = jnp.concatenate([xce, xco], axis=0)               # (32N, 4)

    inputs = (x_im2col, params["pslab"], params["w2col"], params["w3col"], params["l1w"])
    in_specs = [pl.BlockSpec(a.shape, lambda i, nd=a.ndim: (0,) * nd) for a in inputs]

    kern = functools.partial(_disc_fused_kernel, n_batch=N)
    return pl.pallas_call(
        kern,
        out_shape=jax.ShapeDtypeStruct((N, 1), jnp.float32),
        grid=(1,),
        in_specs=in_specs,
        out_specs=pl.BlockSpec((N, 1), lambda i: (0, 0)),
        scratch_shapes=[
            pltpu.VMEM((16 * N + 16, 64), jnp.float32),   # padded h1 for strided taps
            pltpu.VMEM((4 * N, 128), jnp.float32),        # h2 for conv3 lane-fold
        ],
        compiler_params=pltpu.CompilerParams(dimension_semantics=("arbitrary",)),
    )(*inputs)


# --------------------------------------------------------------------------
# Deterministic parameter init (PyTorch default-style uniform(-1/sqrt(fan_in), ...)),
# stored directly in the kernel-friendly layout:
#   * w2col / w3col: im2col weight slabs (K*Cin, Cout)
#   * l1w: (in=128, out=24)
#   * everything small packed into one (16, 128) slab (see row map above)
# --------------------------------------------------------------------------
def _uniform(key, shape, fan_in):
    bound = 1.0 / (float(fan_in) ** 0.5)
    return jax.random.uniform(key, shape, jnp.float32, -bound, bound)


def init_params(key):
    ks = jax.random.split(key, 10)
    w1_t = _uniform(ks[0], (64, 1, 4), 1 * 4)            # torch Conv1d (Cout, Cin, K)
    b1 = _uniform(ks[1], (64,), 1 * 4)
    w2_t = _uniform(ks[2], (128, 64, 4), 64 * 4)
    b2 = _uniform(ks[3], (128,), 64 * 4)
    w3_t = _uniform(ks[4], (128, 128, 4), 128 * 4)
    b3 = _uniform(ks[5], (128,), 128 * 4)
    l1w_t = _uniform(ks[6], (24, 128), 128)              # torch Linear (out, in)
    l1b = _uniform(ks[7], (24,), 128)
    l2w_t = _uniform(ks[8], (1, 24), 24)
    l2b = _uniform(ks[9], (1,), 24)

    pslab = jnp.zeros((16, 128), jnp.float32)
    pslab = pslab.at[0:4, 0:64].set(jnp.transpose(w1_t[:, 0, :], (1, 0)))  # (K, Cout)
    pslab = pslab.at[_B1, 0:64].set(b1)
    pslab = pslab.at[_G1, 0:64].set(jnp.ones((64,), jnp.float32))
    pslab = pslab.at[_BT1, 0:64].set(jnp.zeros((64,), jnp.float32))
    pslab = pslab.at[_B2, :].set(b2)
    pslab = pslab.at[_G2, :].set(jnp.ones((128,), jnp.float32))
    pslab = pslab.at[_BT2, :].set(jnp.zeros((128,), jnp.float32))
    pslab = pslab.at[_B3, :].set(b3)
    pslab = pslab.at[_L1B, 0:24].set(l1b)
    pslab = pslab.at[_L2W, 0:24].set(l2w_t[0])
    pslab = pslab.at[_L2B, 0].set(l2b[0])

    return {
        "pslab": pslab,
        "w2col": jnp.transpose(w2_t, (2, 1, 0)).reshape(4 * 64, 128),    # (256, 128)
        "w3col": jnp.transpose(w3_t, (2, 1, 0)).reshape(4 * 128, 128),   # (512, 128)
        "l1w": jnp.transpose(l1w_t, (1, 0)),                             # (128, 24)
    }


if __name__ == "__main__":
    key = jax.random.PRNGKey(0)
    pkey, xkey = jax.random.split(key)
    params = init_params(pkey)
    # Input length 64 so conv3 (k=4, no pad) sees exactly 4 positions -> length-1 output.
    x = jax.random.normal(xkey, (2, 1, 64), jnp.float32)
    fwd = jax.jit(discriminator_forward)
    y = jax.block_until_ready(fwd(params, x))
    assert y.shape == (2, 1)
    assert bool(jnp.all((y >= 0.0) & (y <= 1.0)))
    print("KERNEL_OK")
</pallas_src>

<mosaic_0001>
module attributes {stable_mosaic.version = 11 : i64} {
  func.func @_disc_fused_kernel(%arg0: i32, %arg1: memref<64x4xf32, #tpu.memory_space<vmem>>, %arg2: memref<16x128xf32, #tpu.memory_space<vmem>>, %arg3: memref<256x128xf32, #tpu.memory_space<vmem>>, %arg4: memref<512x128xf32, #tpu.memory_space<vmem>>, %arg5: memref<128x24xf32, #tpu.memory_space<vmem>>, %arg6: memref<2x1xf32, #tpu.memory_space<vmem>>, %arg7: memref<48x64xf32, #tpu.memory_space<vmem>>, %arg8: memref<8x128xf32, #tpu.memory_space<vmem>>) attributes {dimension_semantics = [#tpu.dimension_semantics<arbitrary>], iteration_bounds = array<i64: 1>, scalar_prefetch = 0 : i64, scratch_operands = 2 : i64, tpu.core_type = #tpu.core_type<tc>, window_params = [{pipeline_mode = #tpu.pipeline_mode<synchronous>, transform_indices = @transform_0, window_bounds = array<i64: 64, 4>}, {pipeline_mode = #tpu.pipeline_mode<synchronous>, transform_indices = @transform_1, window_bounds = array<i64: 16, 128>}, {pipeline_mode = #tpu.pipeline_mode<synchronous>, transform_indices = @transform_2, window_bounds = array<i64: 256, 128>}, {pipeline_mode = #tpu.pipeline_mode<synchronous>, transform_indices = @transform_3, window_bounds = array<i64: 512, 128>}, {pipeline_mode = #tpu.pipeline_mode<synchronous>, transform_indices = @transform_4, window_bounds = array<i64: 128, 24>}, {pipeline_mode = #tpu.pipeline_mode<synchronous>, transform_indices = @transform_5, window_bounds = array<i64: 2, 1>}]} {
    %c0 = arith.constant 0 : index
    %c0_0 = arith.constant 0 : index
    %0 = vector.load %arg2[%c0, %c0_0] : memref<16x128xf32, #tpu.memory_space<vmem>>, vector<16x128xf32>
    %1 = vector.extract_strided_slice %0 {offsets = [0, 0], sizes = [4, 64], strides = [1, 1]} : vector<16x128xf32> to vector<4x64xf32>
    %2 = vector.extract_strided_slice %0 {offsets = [4, 0], sizes = [1, 64], strides = [1, 1]} : vector<16x128xf32> to vector<1x64xf32>
    %3 = vector.extract_strided_slice %0 {offsets = [5, 0], sizes = [1, 64], strides = [1, 1]} : vector<16x128xf32> to vector<1x64xf32>
    %4 = vector.extract_strided_slice %0 {offsets = [6, 0], sizes = [1, 64], strides = [1, 1]} : vector<16x128xf32> to vector<1x64xf32>
    %5 = vector.extract_strided_slice %0 {offsets = [7, 0], sizes = [1, 128], strides = [1, 1]} : vector<16x128xf32> to vector<1x128xf32>
    %6 = vector.extract_strided_slice %0 {offsets = [8, 0], sizes = [1, 128], strides = [1, 1]} : vector<16x128xf32> to vector<1x128xf32>
    %7 = vector.extract_strided_slice %0 {offsets = [9, 0], sizes = [1, 128], strides = [1, 1]} : vector<16x128xf32> to vector<1x128xf32>
    %8 = vector.extract_strided_slice %0 {offsets = [10, 0], sizes = [1, 128], strides = [1, 1]} : vector<16x128xf32> to vector<1x128xf32>
    %9 = vector.extract_strided_slice %0 {offsets = [11, 0], sizes = [1, 24], strides = [1, 1]} : vector<16x128xf32> to vector<1x24xf32>
    %10 = vector.extract_strided_slice %0 {offsets = [12, 0], sizes = [1, 24], strides = [1, 1]} : vector<16x128xf32> to vector<1x24xf32>
    %11 = vector.extract_strided_slice %0 {offsets = [13, 0], sizes = [1, 1], strides = [1, 1]} : vector<16x128xf32> to vector<1x1xf32>
    %c0_1 = arith.constant 0 : index
    %c0_2 = arith.constant 0 : index
    %12 = vector.load %arg1[%c0_1, %c0_2] : memref<64x4xf32, #tpu.memory_space<vmem>>, vector<64x4xf32>
    %cst = arith.constant dense<0.000000e+00> : vector<64x64xf32>
    %13 = tpu.matmul %12, %1, %cst {dimension_numbers = #tpu.dot_dimension_numbers<[1], [0], [0], [1], [0, 0, 1, 1], [], []>} : vector<64x4xf32>, vector<4x64xf32>, vector<64x64xf32> -> vector<64x64xf32>
    %14 = vector.extract_strided_slice %13 {offsets = [0, 0], sizes = [32, 64], strides = [1, 1]} : vector<64x64xf32> to vector<32x64xf32>
    %15 = vector.extract_strided_slice %13 {offsets = [32, 0], sizes = [32, 64], strides = [1, 1]} : vector<64x64xf32> to vector<32x64xf32>
    %16 = arith.maximumf %14, %15 : vector<32x64xf32>
    %17 = vector.broadcast %2 : vector<1x64xf32> to vector<32x64xf32>
    %18 = arith.addf %16, %17 : vector<32x64xf32>
    %cst_3 = arith.constant 0.000000e+00 : f32
    %19 = vector.broadcast %cst_3 : f32 to vector<32x64xf32>
    %20 = arith.cmpf ogt, %18, %19 : vector<32x64xf32>
    %cst_4 = arith.constant 2.000000e-01 : f32
    %21 = vector.broadcast %cst_4 : f32 to vector<32x64xf32>
    %22 = arith.mulf %21, %18 : vector<32x64xf32>
    %23 = arith.select %20, %18, %22 : vector<32x64xi1>, vector<32x64xf32>
    %cst_5 = arith.constant dense<0.000000e+00> : vector<64xf32>
    %24 = vector.multi_reduction <add>, %23, %cst_5 [0] : vector<32x64xf32> to vector<64xf32>
    %25 = vector.shape_cast %24 : vector<64xf32> to vector<1x64xf32>
    %cst_6 = arith.constant 3.200000e+01 : f32
    %26 = vector.broadcast %cst_6 : f32 to vector<1x64xf32>
    %27 = arith.divf %25, %26 : vector<1x64xf32>
    %28 = vector.broadcast %27 : vector<1x64xf32> to vector<32x64xf32>
    %29 = arith.subf %23, %28 : vector<32x64xf32>
    %30 = arith.mulf %29, %29 : vector<32x64xf32>
    %cst_7 = arith.constant dense<0.000000e+00> : vector<64xf32>
    %31 = vector.multi_reduction <add>, %30, %cst_7 [0] : vector<32x64xf32> to vector<64xf32>
    %32 = vector.shape_cast %31 : vector<64xf32> to vector<1x64xf32>
    %cst_8 = arith.constant 3.200000e+01 : f32
    %33 = vector.broadcast %cst_8 : f32 to vector<1x64xf32>
    %34 = arith.divf %32, %33 : vector<1x64xf32>
    %cst_9 = arith.constant 9.99999974E-6 : f32
    %35 = vector.broadcast %cst_9 : f32 to vector<1x64xf32>
    %36 = arith.addf %34, %35 : vector<1x64xf32>
    %37 = math.rsqrt %36 : vector<1x64xf32>
    %38 = vector.broadcast %37 : vector<1x64xf32> to vector<32x64xf32>
    %39 = arith.mulf %29, %38 : vector<32x64xf32>
    %40 = vector.broadcast %3 : vector<1x64xf32> to vector<32x64xf32>
    %41 = arith.mulf %39, %40 : vector<32x64xf32>
    %42 = vector.broadcast %4 : vector<1x64xf32> to vector<32x64xf32>
    %43 = arith.addf %41, %42 : vector<32x64xf32>
    %cst_10 = arith.constant 0.000000e+00 : f32
    %44 = vector.broadcast %cst_10 : f32 to vector<8x64xf32>
    %c0_11 = arith.constant 0 : index
    %c0_12 = arith.constant 0 : index
    %45 = vector.load %arg7[%c0_11, %c0_12] : memref<48x64xf32, #tpu.memory_space<vmem>>, vector<8x64xf32>
    tpu.vector_store %arg7[%c0_11, %c0_12], %44 {strides = array<i32>} : memref<48x64xf32, #tpu.memory_space<vmem>>, vector<8x64xf32>,
    %cst_13 = arith.constant 0.000000e+00 : f32
    %46 = vector.broadcast %cst_13 : f32 to vector<8x64xf32>
    %c40 = arith.constant 40 : index
    %c0_14 = arith.constant 0 : index
    %47 = vector.load %arg7[%c40, %c0_14] : memref<48x64xf32, #tpu.memory_space<vmem>>, vector<8x64xf32>
    tpu.vector_store %arg7[%c40, %c0_14], %46 {strides = array<i32>} : memref<48x64xf32, #tpu.memory_space<vmem>>, vector<8x64xf32>,
    %c8 = arith.constant 8 : index
    %c0_15 = arith.constant 0 : index
    %48 = vector.load %arg7[%c8, %c0_15] : memref<48x64xf32, #tpu.memory_space<vmem>>, vector<32x64xf32>
    tpu.vector_store %arg7[%c8, %c0_15], %43 {strides = array<i32>} : memref<48x64xf32, #tpu.memory_space<vmem>>, vector<32x64xf32>,
    %c7 = arith.constant 7 : index
    %c0_16 = arith.constant 0 : index
    %49 = tpu.strided_load %arg7[%c7, %c0_16] {strides = array<i32: 4, 1>} : memref<48x64xf32, #tpu.memory_space<vmem>>, vector<8x64xf32>
    %c8_17 = arith.constant 8 : index
    %c0_18 = arith.constant 0 : index
    %50 = tpu.strided_load %arg7[%c8_17, %c0_18] {strides = array<i32: 4, 1>} : memref<48x64xf32, #tpu.memory_space<vmem>>, vector<8x64xf32>
    %c9 = arith.constant 9 : index
    %c0_19 = arith.constant 0 : index
    %51 = tpu.strided_load %arg7[%c9, %c0_19] {strides = array<i32: 4, 1>} : memref<48x64xf32, #tpu.memory_space<vmem>>, vector<8x64xf32>
    %c10 = arith.constant 10 : index
    %c0_20 = arith.constant 0 : index
    %52 = tpu.strided_load %arg7[%c10, %c0_20] {strides = array<i32: 4, 1>} : memref<48x64xf32, #tpu.memory_space<vmem>>, vector<8x64xf32>
    %c11 = arith.constant 11 : index
    %c0_21 = arith.constant 0 : index
    %53 = tpu.strided_load %arg7[%c11, %c0_21] {strides = array<i32: 4, 1>} : memref<48x64xf32, #tpu.memory_space<vmem>>, vector<8x64xf32>
    %c12 = arith.constant 12 : index
    %c0_22 = arith.constant 0 : index
    %54 = tpu.strided_load %arg7[%c12, %c0_22] {strides = array<i32: 4, 1>} : memref<48x64xf32, #tpu.memory_space<vmem>>, vector<8x64xf32>
    %55 = tpu.iota {dimensions = array<i32: 0>} : vector<8x64xi32>
    %c4_i32 = arith.constant 4 : i32
    %c0_i32 = arith.constant 0 : i32
    %56 = arith.cmpi eq, %c4_i32, %c0_i32 : i32
    %c1_i32 = arith.constant 1 : i32
    %57 = arith.select %56, %c1_i32, %c4_i32 : i32
    %58 = vector.broadcast %57 : i32 to vector<8x64xi32>
    %59 = arith.remsi %55, %58 : vector<8x64xi32>
    %c0_i32_23 = arith.constant 0 : i32
    %60 = vector.broadcast %c0_i32_23 : i32 to vector<8x64xi32>
    %61 = arith.cmpi ne, %59, %60 : vector<8x64xi32>
    %c0_i32_24 = arith.constant 0 : i32
    %62 = vector.broadcast %c0_i32_24 : i32 to vector<8x64xi32>
    %63 = arith.cmpi slt, %59, %62 : vector<8x64xi32>
    %c0_i32_25 = arith.constant 0 : i32
    %64 = arith.cmpi slt, %57, %c0_i32_25 : i32
    %65 = vector.broadcast %64 : i1 to vector<8x64xi1>
    %66 = vector.broadcast %65 : vector<8x64xi1> to vector<8x64xi1>
    %67 = arith.xori %63, %66 : vector<8x64xi1>
    %68 = arith.andi %67, %61 : vector<8x64xi1>
    %69 = vector.broadcast %57 : i32 to vector<8x64xi32>
    %70 = arith.addi %59, %69 : vector<8x64xi32>
    %71 = arith.select %68, %70, %59 : vector<8x64xi1>, vector<8x64xi32>
    %c0_i32_26 = arith.constant 0 : i32
    %72 = vector.broadcast %c0_i32_26 : i32 to vector<8x64xi32>
    %73 = arith.cmpi eq, %71, %72 : vector<8x64xi32>
    %cst_27 = arith.constant 0.000000e+00 : f32
    %74 = vector.broadcast %cst_27 : f32 to vector<8x64xf32>
    %75 = arith.select %73, %74, %49 : vector<8x64xi1>, vector<8x64xf32>
    %c3_i32 = arith.constant 3 : i32
    %76 = vector.broadcast %c3_i32 : i32 to vector<8x64xi32>
    %77 = arith.cmpi eq, %71, %76 : vector<8x64xi32>
    %cst_28 = arith.constant 0.000000e+00 : f32
    %78 = vector.broadcast %cst_28 : f32 to vector<8x64xf32>
    %79 = arith.select %77, %78, %54 : vector<8x64xi1>, vector<8x64xf32>
    %80 = tpu.concatenate %75, %50, %51, %52 in 1 : vector<8x64xf32>, vector<8x64xf32>, vector<8x64xf32>, vector<8x64xf32> -> vector<8x256xf32>
    %81 = tpu.concatenate %51, %52, %53, %79 in 1 : vector<8x64xf32>, vector<8x64xf32>, vector<8x64xf32>, vector<8x64xf32> -> vector<8x256xf32>
    %82 = tpu.concatenate %80, %81 in 0 : vector<8x256xf32>, vector<8x256xf32> -> vector<16x256xf32>
    %c0_29 = arith.constant 0 : index
    %c0_30 = arith.constant 0 : index
    %83 = vector.load %arg3[%c0_29, %c0_30] : memref<256x128xf32, #tpu.memory_space<vmem>>, vector<256x128xf32>
    %cst_31 = arith.constant dense<0.000000e+00> : vector<16x128xf32>
    %84 = tpu.matmul %82, %83, %cst_31 {dimension_numbers = #tpu.dot_dimension_numbers<[1], [0], [0], [1], [0, 0, 1, 1], [], []>} : vector<16x256xf32>, vector<256x128xf32>, vector<16x128xf32> -> vector<16x128xf32>
    %85 = vector.extract_strided_slice %84 {offsets = [0, 0], sizes = [8, 128], strides = [1, 1]} : vector<16x128xf32> to vector<8x128xf32>
    %86 = vector.extract_strided_slice %84 {offsets = [8, 0], sizes = [8, 128], strides = [1, 1]} : vector<16x128xf32> to vector<8x128xf32>
    %87 = arith.maximumf %85, %86 : vector<8x128xf32>
    %88 = vector.broadcast %5 : vector<1x128xf32> to vector<8x128xf32>
    %89 = arith.addf %87, %88 : vector<8x128xf32>
    %cst_32 = arith.constant 0.000000e+00 : f32
    %90 = vector.broadcast %cst_32 : f32 to vector<8x128xf32>
    %91 = arith.cmpf ogt, %89, %90 : vector<8x128xf32>
    %cst_33 = arith.constant 2.000000e-01 : f32
    %92 = vector.broadcast %cst_33 : f32 to vector<8x128xf32>
    %93 = arith.mulf %92, %89 : vector<8x128xf32>
    %94 = arith.select %91, %89, %93 : vector<8x128xi1>, vector<8x128xf32>
    %cst_34 = arith.constant dense<0.000000e+00> : vector<128xf32>
    %95 = vector.multi_reduction <add>, %94, %cst_34 [0] : vector<8x128xf32> to vector<128xf32>
    %96 = vector.shape_cast %95 : vector<128xf32> to vector<1x128xf32>
    %cst_35 = arith.constant 8.000000e+00 : f32
    %97 = vector.broadcast %cst_35 : f32 to vector<1x128xf32>
    %98 = arith.divf %96, %97 : vector<1x128xf32>
    %99 = vector.broadcast %98 : vector<1x128xf32> to vector<8x128xf32>
    %100 = arith.subf %94, %99 : vector<8x128xf32>
    %101 = arith.mulf %100, %100 : vector<8x128xf32>
    %cst_36 = arith.constant dense<0.000000e+00> : vector<128xf32>
    %102 = vector.multi_reduction <add>, %101, %cst_36 [0] : vector<8x128xf32> to vector<128xf32>
    %103 = vector.shape_cast %102 : vector<128xf32> to vector<1x128xf32>
    %cst_37 = arith.constant 8.000000e+00 : f32
    %104 = vector.broadcast %cst_37 : f32 to vector<1x128xf32>
    %105 = arith.divf %103, %104 : vector<1x128xf32>
    %cst_38 = arith.constant 9.99999974E-6 : f32
    %106 = vector.broadcast %cst_38 : f32 to vector<1x128xf32>
    %107 = arith.addf %105, %106 : vector<1x128xf32>
    %108 = math.rsqrt %107 : vector<1x128xf32>
    %109 = vector.broadcast %108 : vector<1x128xf32> to vector<8x128xf32>
    %110 = arith.mulf %100, %109 : vector<8x128xf32>
    %111 = vector.broadcast %6 : vector<1x128xf32> to vector<8x128xf32>
    %112 = arith.mulf %110, %111 : vector<8x128xf32>
    %113 = vector.broadcast %7 : vector<1x128xf32> to vector<8x128xf32>
    %114 = arith.addf %112, %113 : vector<8x128xf32>
    %c0_39 = arith.constant 0 : index
    %c0_40 = arith.constant 0 : index
    %115 = vector.load %arg8[%c0_39, %c0_40] : memref<8x128xf32, #tpu.memory_space<vmem>>, vector<8x128xf32>
    tpu.vector_store %arg8[%c0_39, %c0_40], %114 {strides = array<i32>} : memref<8x128xf32, #tpu.memory_space<vmem>>, vector<8x128xf32>,
    %c0_41 = arith.constant 0 : index
    %c0_42 = arith.constant 0 : index
    %116 = tpu.strided_load %arg8[%c0_41, %c0_42] {strides = array<i32: 4, 1>} : memref<8x128xf32, #tpu.memory_space<vmem>>, vector<2x128xf32>
    %c1 = arith.constant 1 : index
    %c0_43 = arith.constant 0 : index
    %117 = tpu.strided_load %arg8[%c1, %c0_43] {strides = array<i32: 4, 1>} : memref<8x128xf32, #tpu.memory_space<vmem>>, vector<2x128xf32>
    %c2 = arith.constant 2 : index
    %c0_44 = arith.constant 0 : index
    %118 = tpu.strided_load %arg8[%c2, %c0_44] {strides = array<i32: 4, 1>} : memref<8x128xf32, #tpu.memory_space<vmem>>, vector<2x128xf32>
    %c3 = arith.constant 3 : index
    %c0_45 = arith.constant 0 : index
    %119 = tpu.strided_load %arg8[%c3, %c0_45] {strides = array<i32: 4, 1>} : memref<8x128xf32, #tpu.memory_space<vmem>>, vector<2x128xf32>
    %120 = tpu.concatenate %116, %117, %118, %119 in 1 : vector<2x128xf32>, vector<2x128xf32>, vector<2x128xf32>, vector<2x128xf32> -> vector<2x512xf32>
    %c0_46 = arith.constant 0 : index
    %c0_47 = arith.constant 0 : index
    %121 = vector.load %arg4[%c0_46, %c0_47] : memref<512x128xf32, #tpu.memory_space<vmem>>, vector<512x128xf32>
    %cst_48 = arith.constant dense<0.000000e+00> : vector<2x128xf32>
    %122 = tpu.matmul %120, %121, %cst_48 {dimension_numbers = #tpu.dot_dimension_numbers<[1], [0], [0], [1], [0, 0, 1, 1], [], []>} : vector<2x512xf32>, vector<512x128xf32>, vector<2x128xf32> -> vector<2x128xf32>
    %123 = vector.broadcast %8 : vector<1x128xf32> to vector<2x128xf32>
    %124 = arith.addf %122, %123 : vector<2x128xf32>
    %c0_49 = arith.constant 0 : index
    %c0_50 = arith.constant 0 : index
    %125 = vector.load %arg5[%c0_49, %c0_50] : memref<128x24xf32, #tpu.memory_space<vmem>>, vector<128x24xf32>
    %cst_51 = arith.constant dense<0.000000e+00> : vector<2x24xf32>
    %126 = tpu.matmul %124, %125, %cst_51 {dimension_numbers = #tpu.dot_dimension_numbers<[1], [0], [0], [1], [0, 0, 1, 1], [], []>} : vector<2x128xf32>, vector<128x24xf32>, vector<2x24xf32> -> vector<2x24xf32>
    %127 = vector.broadcast %9 : vector<1x24xf32> to vector<2x24xf32>
    %128 = arith.addf %126, %127 : vector<2x24xf32>
    %129 = math.tanh %128 : vector<2x24xf32>
    %130 = vector.broadcast %10 : vector<1x24xf32> to vector<2x24xf32>
    %131 = arith.mulf %129, %130 : vector<2x24xf32>
    %cst_52 = arith.constant dense<0.000000e+00> : vector<2xf32>
    %132 = vector.multi_reduction <add>, %131, %cst_52 [1] : vector<2x24xf32> to vector<2xf32>
    %133 = vector.shape_cast %132 : vector<2xf32> to vector<2x1xf32>
    %134 = vector.broadcast %11 : vector<1x1xf32> to vector<2x1xf32>
    %135 = arith.addf %133, %134 : vector<2x1xf32>
    %136 = arith.negf %135 : vector<2x1xf32>
    %137 = math.exp %136 : vector<2x1xf32>
    %cst_53 = arith.constant 1.000000e+00 : f32
    %138 = vector.broadcast %cst_53 : f32 to vector<2x1xf32>
    %139 = arith.addf %138, %137 : vector<2x1xf32>
    %140 = arith.divf %138, %139 : vector<2x1xf32>
    %c0_54 = arith.constant 0 : index
    %c0_55 = arith.constant 0 : index
    %141 = vector.load %arg6[%c0_54, %c0_55] : memref<2x1xf32, #tpu.memory_space<vmem>>, vector<2x1xf32>
    tpu.vector_store %arg6[%c0_54, %c0_55], %140 {strides = array<i32>} : memref<2x1xf32, #tpu.memory_space<vmem>>, vector<2x1xf32>,
    return
  }
  func.func @transform_0(%arg0: i32) -> (i32, i32) {
    %c0_i32 = arith.constant 0 : i32
    %c0_i32_0 = arith.constant 0 : i32
    %c0_i32_1 = arith.constant 0 : i32
    return %c0_i32, %c0_i32_0 : i32, i32
  }
  func.func @transform_1(%arg0: i32) -> (i32, i32) {
    %c0_i32 = arith.constant 0 : i32
    %c0_i32_0 = arith.constant 0 : i32
    %c0_i32_1 = arith.constant 0 : i32
    return %c0_i32, %c0_i32_0 : i32, i32
  }
  func.func @transform_2(%arg0: i32) -> (i32, i32) {
    %c0_i32 = arith.constant 0 : i32
    %c0_i32_0 = arith.constant 0 : i32
    %c0_i32_1 = arith.constant 0 : i32
    return %c0_i32, %c0_i32_0 : i32, i32
  }
  func.func @transform_3(%arg0: i32) -> (i32, i32) {
    %c0_i32 = arith.constant 0 : i32
    %c0_i32_0 = arith.constant 0 : i32
    %c0_i32_1 = arith.constant 0 : i32
    return %c0_i32, %c0_i32_0 : i32, i32
  }
  func.func @transform_4(%arg0: i32) -> (i32, i32) {
    %c0_i32 = arith.constant 0 : i32
    %c0_i32_0 = arith.constant 0 : i32
    %c0_i32_1 = arith.constant 0 : i32
    return %c0_i32, %c0_i32_0 : i32, i32
  }
  func.func @transform_5(%arg0: i32) -> (i32, i32) {
    %c0_i32 = arith.constant 0 : i32
    %c0_i32_0 = arith.constant 0 : i32
    %c0_i32_1 = arith.constant 0 : i32
    return %c0_i32, %c0_i32_0 : i32, i32
  }
}

</mosaic_0001>

<bundles_post_ra>
// kernel: discriminator_forward.1
= control target key start
LH: loop header
LB: loop body
LE: loop exit
PB: predicated region body
PF: predicated region fallthrough
CT: control target
= control target key end

     0   :  { %10 = vsyncpa [#allocation5], 0  ;;  %s1029_s18 = smov [#allocation4]   ;;  %s1324_s0 = inlined_call_operand.vmem [shape: f32[64,4], index: 0, kind: input, shape index: {}]   ;;  %s1325_s1 = inlined_call_operand.vmem [shape: f32[16,128], index: 1, kind: input, shape index: {}]   ;;  %s1326_s2 = inlined_call_operand.vmem [shape: f32[256,128], index: 2, kind: input, shape index: {}]   ;;  %s1327_s3 = inlined_call_operand.hbm [shape: f32[512,128], index: 3, kind: input, shape index: {}]   ;;  %s1328_s4 = inlined_call_operand.vmem [shape: f32[128,24], index: 4, kind: input, shape index: {}]   ;;  %s1329_s5 = inlined_call_operand.vmem [shape: f32[2,1], index: 5, kind: output, shape index: {}]  }
   0x1   :  { %s22_s19 = sshll.u32 %s1029_s18, 4  ;;  %s23_s19 = int_to_ptr.vmem [resolvable:$true] %s22_s19 }
   0x2   :  { %s1015_s20 = scalar_lea.vmem %s23_s19, 8192  ;;  %p1020_p1 = scmp.lt.s32.totalorder %s23_s19, %s23_s19 }
   0x3   :  { %p1016_p0 = scmp.ne.s32.totalorder %s23_s19, %s1015_s20  ;;  %p1021_p2 = scmp.lt.s32.totalorder %s1015_s20, %s1015_s20 }
   0x5   :  { %p1022_p3 = por %p1021_p2, %p1020_p1 }
   0x7   :  { %p1023_p4 = pnand %p1022_p3, %p1016_p0 }
   0x9   :  { %1026 = shalt.err (!%p1023_p4)
}
   0xa   :  { %s1030_s21 = smov 128   ;;  %s1031_s22 = smov 8  }
   0xb   :  { %28 = dma.hbm_to_vmem [thread:$0]  %s1327_s3, 8192, %s23_s19, [#allocation5], %s1030_s21, %s1030_s21, %s1031_s22  }
   0xc   :  { %1027 = dma.done.wait [#allocation5], 8192  }
   0xd   :  { %1028 = vsyncadd [#allocation5], 4294959104  ;;  %vm69_vm0 = vcmask 1043456   ;;  %vm44_vm1 = vcmask 31744   ;;  %v1071_v0 = vld [vmem:[%s1325_s1] sm:$0xff]  ;;  %v37_v2 = vld [vmem:[%s1324_s0 + $0x8] sm:$0xff]  ;;  %v182_v32 = vlaneseq }
   0xe   :  { %v36_v1 = vld [vmem:[%s1324_s0] sm:$0xff]  ;;  %937 = vmatprep.subr.msk.mxu0 %vm69_vm0, %v1071_v0  ;;  %v38_v3 = vld [vmem:[%s1324_s0 + $0x10] sm:$0xff]  ;;  %v39_v4 = vld [vmem:[%s1324_s0 + $0x18] sm:$0xff]  ;;  %vm202_vm2 = vcmask 523264   ;;  %v1032_v9 = vmov 0.0   ;;  %vm1034_vm10 = vmmov 0  }
   0xf   :  { %939 = vmatprep.mubr.msk.f32.mxu0 %vm44_vm1, %v36_v1  ;;  %938 = vmatpush3.msk.msra.mxu0 %vm69_vm0, %v1071_v0  ;;  %v40_v5 = vld [vmem:[%s1324_s0 + $0x20] sm:$0xff]  ;;  %v41_v6 = vld [vmem:[%s1324_s0 + $0x28] sm:$0xff]  ;;  %v42_v7 = vld [vmem:[%s1324_s0 + $0x30] sm:$0xff]  ;;  %263 = vst.msk [vmem:[#allocation2 + $0x28] sm:$0xff] %vm202_vm2, %v1032_v9  ;;  %v1189_v37 = vshrl.u32 %v182_v32, 7  ;;  %vm771_vm11 = vcmask 189440  }
  0x10   :  { %940 = vmatmul.mubr.msk.f32.vlgmr.msra.gmra.mxu0 %vm44_vm1, %v37_v2  ;;  %v43_v8 = vld [vmem:[%s1324_s0 + $0x38] sm:$0xff]  ;;  %262 = vst.msk [vmem:[#allocation2] sm:$0xff] %vm202_vm2, %v1032_v9  ;;  %v343_v12 = vld [vmem:[%s1326_s2 + $0xf0] sm:$0xff]  ;;  %v342_v14 = vld [vmem:[%s1326_s2 + $0xe8] sm:$0xff]  ;;  %vm786_vm12 = vcmask 1024  }
  0x11   :  { %942 = vmatprep.mubr.msk.f32.mxu0 %vm44_vm1, %v38_v3  ;;  %v344_v10 = vld [vmem:[%s1326_s2 + $0xf8] sm:$0xff]  ;;  %v327_v13 = vld [vmem:[%s1326_s2 + $0x70] sm:$0xff]  ;;  %v326_v15 = vld [vmem:[%s1326_s2 + $0x68] sm:$0xff]  ;;  %v184_v42 = vsub.s32 4, %v1189_v37 }
  0x12   :  { %v328_v11 = vld [vmem:[%s1326_s2 + $0x78] sm:$0xff]  ;;  %812 = vmatprep.subr.mxu1 %v344_v10  ;;  %v341_v16 = vld [vmem:[%s1326_s2 + $0xe0] sm:$0xff]  ;;  %v339_v20 = vld [vmem:[%s1326_s2 + $0xd0] sm:$0xff] }
  0x13   :  { %813 = vmatpush3.msra.mxu1 %v328_v11  ;;  %v325_v17 = vld [vmem:[%s1326_s2 + $0x60] sm:$0xff]  ;;  %v340_v18 = vld [vmem:[%s1326_s2 + $0xd8] sm:$0xff]  ;;  %v323_v21 = vld [vmem:[%s1326_s2 + $0x50] sm:$0xff]  ;;  %v185_v45 = vrot.slane %v1071_v0, %v184_v42 }
  0x14   :  { %943 = vmatmul.mubr.msk.f32.gmra.mxu0 %vm44_vm1, %v39_v4  ;;  %814 = vmatprep.subr.mxu1 %v343_v12  ;;  %v324_v19 = vld [vmem:[%s1326_s2 + $0x58] sm:$0xff]  ;;  %v338_v22 = vld [vmem:[%s1326_s2 + $0xc8] sm:$0xff]  ;;  %v337_v24 = vld [vmem:[%s1326_s2 + $0xc0] sm:$0xff] }
  0x15   :  { %945 = vmatprep.mubr.msk.f32.mxu0 %vm44_vm1, %v40_v5  ;;  %815 = vmatpush3.msra.mxu1 %v327_v13  ;;  %v322_v23 = vld [vmem:[%s1326_s2 + $0x48] sm:$0xff]  ;;  %v321_v25 = vld [vmem:[%s1326_s2 + $0x40] sm:$0xff]  ;;  %v336_v26 = vld [vmem:[%s1326_s2 + $0xb8] sm:$0xff] }
  0x16   :  { %816 = vmatprep.subr.mxu1 %v342_v14  ;;  %v320_v27 = vld [vmem:[%s1326_s2 + $0x38] sm:$0xff]  ;;  %v335_v28 = vld [vmem:[%s1326_s2 + $0xb0] sm:$0xff]  ;;  %v334_v30 = vld [vmem:[%s1326_s2 + $0xa8] sm:$0xff] }
  0x17   :  { %817 = vmatpush3.msra.mxu1 %v326_v15  ;;  %v319_v29 = vld [vmem:[%s1326_s2 + $0x30] sm:$0xff]  ;;  %v318_v31 = vld [vmem:[%s1326_s2 + $0x28] sm:$0xff]  ;;  %v333_v33 = vld [vmem:[%s1326_s2 + $0xa0] sm:$0xff] }
  0x18   :  { %946 = vmatmul.mubr.msk.f32.gmra.mxu0 %vm44_vm1, %v41_v6  ;;  %818 = vmatprep.subr.mxu1 %v341_v16  ;;  %v317_v34 = vld [vmem:[%s1326_s2 + $0x20] sm:$0xff]  ;;  %v332_v35 = vld [vmem:[%s1326_s2 + $0x98] sm:$0xff]  ;;  %v331_v38 = vld [vmem:[%s1326_s2 + $0x90] sm:$0xff] }
  0x19   :  { %948 = vmatprep.mubr.msk.f32.mxu0 %vm44_vm1, %v42_v7  ;;  %819 = vmatpush3.msra.mxu1 %v325_v17  ;;  %v316_v36 = vld [vmem:[%s1326_s2 + $0x18] sm:$0xff]  ;;  %v315_v40 = vld [vmem:[%s1326_s2 + $0x10] sm:$0xff] }
  0x1a   :  { %820 = vmatprep.subr.mxu1 %v340_v18 }
  0x1b   :  { %821 = vmatpush3.msra.mxu1 %v324_v19 }
  0x1c   :  { %949 = vmatmul.mubr.msk.f32.gmra.mxu0 %vm44_vm1, %v43_v8  ;;  %822 = vmatprep.subr.mxu1 %v339_v20 }
  0x1d   :  { %823 = vmatpush3.msra.mxu1 %v323_v21 }
  0x1e   :  { %824 = vmatprep.subr.mxu1 %v338_v22 }
  0x1f   :  { %825 = vmatpush3.msra.mxu1 %v322_v23 }
  0x20   :  { %826 = vmatprep.subr.mxu1 %v337_v24 }
  0x21   :  { %827 = vmatpush3.msra.mxu1 %v321_v25 }
  0x22   :  { %828 = vmatprep.subr.mxu1 %v336_v26 }
  0x23   :  { %829 = vmatpush3.msra.mxu1 %v320_v27 }
  0x24   :  { %830 = vmatprep.subr.mxu1 %v335_v28 }
  0x25   :  { %831 = vmatpush3.msra.mxu1 %v319_v29 }
  0x26   :  { %832 = vmatprep.subr.mxu1 %v334_v30 }
  0x27   :  { %833 = vmatpush3.msra.mxu1 %v318_v31 }
  0x28   :  { %834 = vmatprep.subr.mxu1 %v333_v33 }
  0x29   :  { %835 = vmatpush3.msra.mxu1 %v317_v34 }
  0x2a   :  { %836 = vmatprep.subr.mxu1 %v332_v35 }
  0x2b   :  { %837 = vmatpush3.msra.mxu1 %v316_v36 }
  0x2c   :  { %838 = vmatprep.subr.mxu1 %v331_v38 }
  0x2d   :  { %839 = vmatpush3.msra.mxu1 %v315_v40 }
  0xd0   :  { %v941_v39 = vpop.f32.mrf.mxu0 }
  0xd2   :  { %v139_v41 = vpop.f32.mrf.mxu0 }
  0xd4   :  { %v944_v43 = vpop.f32.mrf.mxu0 }
  0xd6   :  { %v149_v44 = vpop.f32.mrf.mxu0 }
  0xd8   :  { %v947_v46 = vpop.f32.mrf.mxu0 }
  0xd9   :  { %v179_v47 = vmax.f32 %v941_v39, %v947_v46 }
  0xda   :  { %v159_v48 = vpop.f32.mrf.mxu0 }
  0xdb   :  { %v187_v49 = vadd.f32 %v185_v45, %v179_v47  ;;  %v178_v50 = vmax.f32 %v139_v41, %v159_v48 }
  0xdc   :  { %v950_v51 = vpop.f32.mrf.mxu0 }
  0xdd   :  { %v186_v52 = vadd.f32 %v185_v45, %v178_v50  ;;  %v181_v53 = vmax.f32 %v944_v43, %v950_v51  ;;  %v195_v54 = vmul.f32 0.2, %v187_v49  ;;  %vm191_vm3 = vcmp.gt.f32.partialorder %v187_v49, 0.0 }
  0xde   :  { %v169_v55 = vpop.f32.mrf.mxu0  ;;  %v248_v43 = vsub.s32 5, %v1189_v37 }
  0xdf   :  { %vm190_vm4 = vcmp.gt.f32.partialorder %v186_v52, 0.0  ;;  %v194_v56 = vmul.f32 0.2, %v186_v52  ;;  %v189_v57 = vadd.f32 %v185_v45, %v181_v53  ;;  %v180_v58 = vmax.f32 %v149_v44, %v169_v55 }
  0xe0   :  { %v199_v60 = vsel %vm191_vm3, %v187_v49, %v195_v54  ;;  %v256_v44 = vsub.s32 6, %v1189_v37 }
  0xe1   :  { %v198_v59 = vsel %vm190_vm4, %v186_v52, %v194_v56  ;;  %v197_v61 = vmul.f32 0.2, %v189_v57  ;;  %v188_v62 = vadd.f32 %v185_v45, %v180_v58  ;;  %vm193_vm5 = vcmp.gt.f32.partialorder %v189_v57, 0.0  ;;  %v330_v56 = vld [vmem:[%s1326_s2 + $0x88] sm:$0xff]  ;;  %v329_v58 = vld [vmem:[%s1326_s2 + $0x80] sm:$0xff] }
  0xe2   :  { %v203_v63 = vsel %vm202_vm2, %v198_v59, 0.0  ;;  %v204_v2 = vsel %vm202_vm2, %v199_v60, 0.0  ;;  %v249_v45 = vrot.slane %v1071_v0, %v248_v43  ;;  %v257_v47 = vrot.slane %v1071_v0, %v256_v44  ;;  %840 = vmatprep.subr.mxu1 %v330_v56  ;;  %v477_v44 = vld [vmem:[#allocation4 + $0x50] sm:$0xff]  ;;  %v474_v56 = vld [vmem:[#allocation4 + $0x38] sm:$0xff] }
  0xe3   :  { %vm192_vm6 = vcmp.gt.f32.partialorder %v188_v62, 0.0  ;;  %v196_v1 = vmul.f32 0.2, %v188_v62  ;;  %v205_v3 = vadd.f32 %v204_v2, %v203_v63  ;;  %v201_v4 = vsel %vm193_vm5, %v189_v57, %v197_v61  ;;  %v314_v57 = vld [vmem:[%s1326_s2 + $0x8] sm:$0xff] }
  0xe4   :  { %v208_v8 = vsel %vm202_vm2, %v201_v4, 0.0  ;;  %841 = vmatpush3.msra.mxu1 %v314_v57  ;;  %v506_v57 = vld [vmem:[#allocation4 + $0x138] sm:$0xff] }
  0xe5   :  { %v200_v5 = vsel %vm192_vm6, %v188_v62, %v196_v1  ;;  %842 = vmatprep.subr.mxu1 %v329_v58  ;;  %v286_v1 = vand.u32 3, %v1189_v37  ;;  %v489_v58 = vld [vmem:[#allocation4 + $0xb0] sm:$0xff] }
  0xe6   :  { %v206_v6 = vsel %vm202_vm2, %v200_v5, 0.0 }
  0xe7   :  { %v207_v7 = vadd.f32 %v206_v6, %v205_v3  ;;  %vm296_vm7 = vcmp.eq.s32.totalorder %v286_v1, 3  ;;  %vm294_vm8 = vcmp.eq.s32.totalorder %v286_v1, 0  ;;  %v472_v1 = vld [vmem:[#allocation4 + $0x28] sm:$0xff] }
  0xe9   :  { %v209_v10 = vadd.f32 %v208_v8, %v207_v7 }
  0xeb   :  { %v210_v11 = vrot.slane %v209_v10, 4 }
  0xed   :  { %v211_v12 = vadd.f32 %v210_v11, %v209_v10 }
  0xef   :  { %v212_v13 = vrot.slane %v211_v12, 2 }
  0xf1   :  { %v213_v14 = vadd.f32 %v212_v13, %v211_v12 }
  0xf3   :  { %v214_v15 = vrot.slane %v213_v14, 1 }
  0xf5   :  { %v215_v16 = vadd.f32 %v214_v15, %v213_v14 }
  0xf7   :  { %v217_v17 = vmul.f32 0.03125, %v215_v16 }
  0xf9   :  { %v218_v18 = vsub.f32 %v198_v59, %v217_v17  ;;  %v219_v19 = vsub.f32 %v199_v60, %v217_v17  ;;  %v220_v20 = vsub.f32 %v200_v5, %v217_v17  ;;  %v221_v21 = vsub.f32 %v201_v4, %v217_v17  ;;  %v313_v59 = vld [vmem:[%s1326_s2] sm:$0xff]  ;;  %s1033_s2 = smov 64  }
  0xfa   :  { %843 = vmatpush3.msra.mxu1 %v313_v59  ;;  %v521_v59 = vld [vmem:[#allocation4 + $0x1b0] sm:$0xff] }
  0xfb   :  { %v222_v22 = vmul.f32 %v218_v18, %v218_v18  ;;  %v223_v23 = vmul.f32 %v219_v19, %v219_v19  ;;  %v224_v24 = vmul.f32 %v220_v20, %v220_v20  ;;  %v225_v25 = vmul.f32 %v221_v21, %v221_v21 }
  0xfd   :  { %v226_v26 = vsel %vm202_vm2, %v222_v22, 0.0  ;;  %v227_v27 = vsel %vm202_vm2, %v223_v23, 0.0  ;;  %v229_v29 = vsel %vm202_vm2, %v224_v24, 0.0  ;;  %v231_v31 = vsel %vm202_vm2, %v225_v25, 0.0  ;;  %v514_v22 = vld [vmem:[#allocation4 + $0x178] sm:$0xff]  ;;  %v497_v23 = vld [vmem:[#allocation4 + $0xf0] sm:$0xff] }
  0xfe   :  { %v228_v28 = vadd.f32 %v227_v27, %v226_v26  ;;  %v529_v24 = vld [vmem:[#allocation4 + $0x1f0] sm:$0xff]  ;;  %v496_v27 = vld [vmem:[#allocation4 + $0xe8] sm:$0xff] }
  0xff   :  { %v481_v25 = vld [vmem:[#allocation4 + $0x70] sm:$0xff] }
 0x100   :  { %v230_v30 = vadd.f32 %v229_v29, %v228_v28  ;;  %v513_v26 = vld [vmem:[#allocation4 + $0x170] sm:$0xff]  ;;  %v528_v28 = vld [vmem:[#allocation4 + $0x1e8] sm:$0xff] }
 0x101   :  { %v480_v29 = vld [vmem:[#allocation4 + $0x68] sm:$0xff] }
 0x102   :  { %v232_v32 = vadd.f32 %v231_v31, %v230_v30  ;;  %v512_v30 = vld [vmem:[#allocation4 + $0x168] sm:$0xff]  ;;  %v495_v31 = vld [vmem:[#allocation4 + $0xe0] sm:$0xff] }
 0x104   :  { %v233_v33 = vrot.slane %v232_v32, 4 }
 0x106   :  { %v234_v34 = vadd.f32 %v233_v33, %v232_v32  ;;  %v527_v32 = vld [vmem:[#allocation4 + $0x1e0] sm:$0xff] }
 0x107   :  { %v479_v33 = vld [vmem:[#allocation4 + $0x60] sm:$0xff] }
 0x108   :  { %v235_v35 = vrot.slane %v234_v34, 2 }
 0x10a   :  { %v236_v36 = vadd.f32 %v235_v35, %v234_v34  ;;  %v511_v34 = vld [vmem:[#allocation4 + $0x160] sm:$0xff]  ;;  %v494_v35 = vld [vmem:[#allocation4 + $0xd8] sm:$0xff] }
 0x10c   :  { %v237_v38 = vrot.slane %v236_v36, 1 }
 0x10e   :  { %v238_v39 = vadd.f32 %v237_v38, %v236_v36  ;;  %v526_v36 = vld [vmem:[#allocation4 + $0x1d8] sm:$0xff] }
 0x10f   :  { %v478_v38 = vld [vmem:[#allocation4 + $0x58] sm:$0xff] }
 0x110   :  { %v239_v40 = vmul.f32 0.03125, %v238_v39  ;;  %v510_v39 = vld [vmem:[#allocation4 + $0x158] sm:$0xff] }
 0x112   :  { %v240_v41 = vadd.f32 1e-05, %v239_v40  ;;  %v493_v40 = vld [vmem:[#allocation4 + $0xd0] sm:$0xff] }
 0x114   :  { %997 = vrsqrt.f32 %v240_v41  ;;  %v525_v41 = vld [vmem:[#allocation4 + $0x1d0] sm:$0xff] }
 0x121   :  { %v998_v46 = vpop.eup %997 }
 0x122   :  { %v242_v48 = vmul.f32 %v998_v46, %v218_v18  ;;  %v243_v49 = vmul.f32 %v998_v46, %v219_v19  ;;  %v244_v50 = vmul.f32 %v998_v46, %v220_v20  ;;  %v245_v51 = vmul.f32 %v998_v46, %v221_v21  ;;  %v498_v19 = vld [vmem:[#allocation4 + $0xf8] sm:$0xff]  ;;  %v492_v46 = vld [vmem:[#allocation4 + $0xc8] sm:$0xff] }
 0x123   :  { %v530_v20 = vld [vmem:[#allocation4 + $0x1f8] sm:$0xff]  ;;  %850 = vmatprep.subr.mxu0 %v498_v19  ;;  %v500_v19 = vld [vmem:[#allocation4 + $0x108] sm:$0xff] }
 0x124   :  { %v250_v52 = vmul.f32 %v249_v45, %v242_v48  ;;  %v251_v53 = vmul.f32 %v249_v45, %v243_v49  ;;  %v252_v54 = vmul.f32 %v249_v45, %v244_v50  ;;  %v253_v55 = vmul.f32 %v249_v45, %v245_v51  ;;  %885 = vmatprep.subr.mxu1 %v530_v20  ;;  %v482_v21 = vld [vmem:[#allocation4 + $0x78] sm:$0xff]  ;;  %v509_v45 = vld [vmem:[#allocation4 + $0x150] sm:$0xff]  ;;  %v476_v48 = vld [vmem:[#allocation4 + $0x48] sm:$0xff] }
 0x125   :  { %851 = vmatpush3.msra.mxu0 %v482_v21  ;;  %v508_v49 = vld [vmem:[#allocation4 + $0x148] sm:$0xff]  ;;  %v491_v50 = vld [vmem:[#allocation4 + $0xc0] sm:$0xff] }
 0x126   :  { %v258_v60 = vadd.f32 %v257_v47, %v250_v52  ;;  %v259_v61 = vadd.f32 %v257_v47, %v251_v53  ;;  %v260_v62 = vadd.f32 %v257_v47, %v252_v54  ;;  %v261_v63 = vadd.f32 %v257_v47, %v253_v55  ;;  %852 = vmatprep.subr.mxu0 %v497_v23  ;;  %v524_v47 = vld [vmem:[#allocation4 + $0x1c8] sm:$0xff]  ;;  %v523_v51 = vld [vmem:[#allocation4 + $0x1c0] sm:$0xff]  ;;  %v490_v54 = vld [vmem:[#allocation4 + $0xb8] sm:$0xff] }
 0x127   :  { %853 = vmatpush3.msra.mxu0 %v481_v25  ;;  %v475_v52 = vld [vmem:[#allocation4 + $0x40] sm:$0xff]  ;;  %v522_v55 = vld [vmem:[#allocation4 + $0x1b8] sm:$0xff] }
 0x128   :  { %264 = vst.msk [vmem:[#allocation2 + $0x8] sm:$0xff] %vm202_vm2, %v258_v60  ;;  %265 = vst.msk [vmem:[#allocation2 + $0x10] sm:$0xff] %vm202_vm2, %v259_v61  ;;  %854 = vmatprep.subr.mxu0 %v496_v27  ;;  %v507_v53 = vld [vmem:[#allocation4 + $0x140] sm:$0xff]  ;;  %v473_v60 = vld [vmem:[#allocation4 + $0x30] sm:$0xff] }
 0x129   :  { %266 = vst.msk [vmem:[#allocation2 + $0x18] sm:$0xff] %vm202_vm2, %v260_v62  ;;  %267 = vst.msk [vmem:[#allocation2 + $0x20] sm:$0xff] %vm202_vm2, %v261_v63  ;;  %855 = vmatpush3.msra.mxu0 %v480_v29  ;;  %v505_v61 = vld [vmem:[#allocation4 + $0x130] sm:$0xff]  ;;  %v488_v62 = vld [vmem:[#allocation4 + $0xa8] sm:$0xff] }
 0x12a   :  { %856 = vmatprep.subr.mxu0 %v495_v31  ;;  %v520_v63 = vld [vmem:[#allocation4 + $0x1a8] sm:$0xff]  ;;  %v483_v20 = vld [vmem:[#allocation4 + $0x80] sm:$0xff] }
 0x12b   :  { %857 = vmatpush3.msra.mxu0 %v479_v33  ;;  %v515_v21 = vld [vmem:[#allocation4 + $0x180] sm:$0xff] }
 0x12c   :  { %858 = vmatprep.subr.mxu0 %v494_v35  ;;  %v499_v23 = vld [vmem:[#allocation4 + $0x100] sm:$0xff] }
 0x12d   :  { %859 = vmatpush3.msra.mxu0 %v478_v38 }
 0x12e   :  { %860 = vmatprep.subr.mxu0 %v493_v40 }
 0x12f   :  { %861 = vmatpush3.msra.mxu0 %v477_v44 }
 0x130   :  { %v271_v2 = vld [vmem:[#allocation2 + $0x8] ss:$4 sm:$0xff]  ;;  %v275_v3 = vld [vmem:[#allocation2 + $0xa] ss:$4 sm:$0xff]  ;;  %v269_v7 = vld [vmem:[#allocation2 + $0x7] ss:$4 sm:$0xff]  ;;  %862 = vmatprep.subr.mxu0 %v492_v46 }
 0x131   :  { %v992_v4 = vpack.i.bf16 %v271_v2, %v275_v3  ;;  %v279_v5 = vld [vmem:[#allocation2 + $0xc] ss:$4 sm:$0xff]  ;;  %v273_v12 = vld [vmem:[#allocation2 + $0x9] ss:$4 sm:$0xff]  ;;  %v295_v13 = vsel %vm294_vm8, 0.0, %v269_v7  ;;  %863 = vmatpush3.msra.mxu0 %v476_v48 }
 0x132   :  { %v297_v6 = vsel %vm296_vm7, 0.0, %v279_v5  ;;  %v277_v17 = vld [vmem:[#allocation2 + $0xb] ss:$4 sm:$0xff]  ;;  %864 = vmatprep.subr.mxu0 %v491_v50 }
 0x133   :  { %993 = vrot.lane.b32.xlu0 %v992_v4, %s1033_s2  ;;  %865 = vmatpush3.msra.mxu0 %v475_v52  ;;  %v504_v2 = vld [vmem:[#allocation4 + $0x128] sm:$0xff]  ;;  %v487_v3 = vld [vmem:[#allocation4 + $0xa0] sm:$0xff]  ;;  %v486_v7 = vld [vmem:[#allocation4 + $0x98] sm:$0xff] }
 0x134   :  { %866 = vmatprep.subr.mxu0 %v490_v54  ;;  %v519_v4 = vld [vmem:[#allocation4 + $0x1a0] sm:$0xff] }
 0x135   :  { %867 = vmatpush3.msra.mxu0 %v474_v56  ;;  %v471_v5 = vld [vmem:[#allocation4 + $0x20] sm:$0xff]  ;;  %v1242_v56 = vld [vmem:[%s1325_s1 + $0x8] sm:$0xff] }
 0x136   :  { %868 = vmatprep.subr.mxu0 %v489_v58 }
 0x137   :  { %309 = vrot.lane.b32.xlu0 %v297_v6, %s1033_s2  ;;  %869 = vmatpush3.msra.mxu0 %v473_v60  ;;  %v503_v6 = vld [vmem:[#allocation4 + $0x120] sm:$0xff] }
 0x138   :  { %870 = vmatprep.subr.mxu0 %v488_v62 }
 0x139   :  { %871 = vmatpush3.msra.mxu0 %v472_v1  ;;  %v690_v1 = vld [vmem:[%s1328_s4 + $0x78] sm:$0xff] }
 0x13a   :  { %872 = vmatprep.subr.mxu0 %v487_v3 }
 0x13b   :  { %873 = vmatpush3.msra.mxu0 %v471_v5 }
 0x13c   :  { %874 = vmatprep.subr.mxu0 %v486_v7  ;;  %v688_v7 = vld [vmem:[%s1328_s4 + $0x68] sm:$0xff] }
 0x1a5   :  { %v994_v8 = vpop.permute.xlu0 %993 }
 0x1a6   :  { %v996_v10 = vunpack.i.h.bf16 %v994_v8  ;;  %v995_v11 = vunpack.i.l.bf16 %v994_v8  ;;  %v518_v8 = vld [vmem:[#allocation4 + $0x198] sm:$0xff] }
 0x1a8   :  { %v307_v14 = vsel %vm202_vm2, %v273_v12, %v995_v11  ;;  %v306_v15 = vsel %vm202_vm2, %v295_v13, %v996_v10  ;;  %v470_v10 = vld [vmem:[#allocation4 + $0x18] sm:$0xff]  ;;  %v485_v12 = vld [vmem:[#allocation4 + $0x90] sm:$0xff] }
 0x1a9   :  { %v310_v16 = vpop.permute.xlu0 %309  ;;  %409 = vmatprep.mubr.f32.mxu1 %v307_v14  ;;  %v502_v11 = vld [vmem:[#allocation4 + $0x118] sm:$0xff]  ;;  %v517_v13 = vld [vmem:[#allocation4 + $0x190] sm:$0xff]  ;;  %875 = vmatpush3.msra.mxu0 %v470_v10  ;;  %v686_v10 = vld [vmem:[%s1328_s4 + $0x58] sm:$0xff] }
 0x1aa   :  { %410 = vmatmul.mubr.f32.vlgmr.msra.gmra.mxu1 %v306_v15  ;;  %v312_v18 = vsel %vm202_vm2, %v277_v17, %v310_v16  ;;  %v501_v15 = vld [vmem:[#allocation4 + $0x110] sm:$0xff]  ;;  %v484_v16 = vld [vmem:[#allocation4 + $0x88] sm:$0xff]  ;;  %876 = vmatprep.subr.mxu0 %v485_v12 }
 0x1ab   :  { %414 = vmatprep.mubr.f32.mxu1 %v312_v18  ;;  %886 = vmatpush3.msra.mxu1 %v514_v22  ;;  %v516_v17 = vld [vmem:[#allocation4 + $0x188] sm:$0xff]  ;;  %v467_v22 = vld [vmem:[#allocation4] sm:$0xff]  ;;  %v684_v12 = vld [vmem:[%s1328_s4 + $0x48] sm:$0xff] }
 0x1ac   :  { %887 = vmatprep.subr.mxu1 %v529_v24  ;;  %v468_v18 = vld [vmem:[#allocation4 + $0x8] sm:$0xff] }
 0x1ad   :  { %888 = vmatpush3.msra.mxu1 %v513_v26  ;;  %v423_v26 = vsub.s32 7, %v1189_v37 }
 0x1ae   :  { %415 = vmatmul.mubr.f32.gmra.mxu1 %v307_v14  ;;  %889 = vmatprep.subr.mxu1 %v528_v28  ;;  %v469_v14 = vld [vmem:[#allocation4 + $0x10] sm:$0xff] }
 0x1af   :  { %890 = vmatpush3.msra.mxu1 %v512_v30  ;;  %877 = vmatpush3.msra.mxu0 %v469_v14  ;;  %v424_v31 = vrot.slane %v1071_v0, %v423_v26  ;;  %v682_v14 = vld [vmem:[%s1328_s4 + $0x38] sm:$0xff] }
 0x1b0   :  { %891 = vmatprep.subr.mxu1 %v527_v32  ;;  %878 = vmatprep.subr.mxu0 %v484_v16  ;;  %v680_v16 = vld [vmem:[%s1328_s4 + $0x28] sm:$0xff] }
 0x1b1   :  { %892 = vmatpush3.msra.mxu1 %v511_v34  ;;  %879 = vmatpush3.msra.mxu0 %v468_v18  ;;  %v678_v18 = vld [vmem:[%s1328_s4 + $0x18] sm:$0xff] }
 0x1b2   :  { %893 = vmatprep.subr.mxu1 %v526_v36  ;;  %880 = vmatprep.subr.mxu0 %v483_v20  ;;  %v676_v20 = vld [vmem:[%s1328_s4 + $0x8] sm:$0xff] }
 0x1b3   :  { %894 = vmatpush3.msra.mxu1 %v510_v39  ;;  %881 = vmatpush3.msra.mxu0 %v467_v22  ;;  %v533_v22 = vsub.s32 2, %v1189_v37 }
 0x1b4   :  { %895 = vmatprep.subr.mxu1 %v525_v41  ;;  %951 = vmatprep.subr.mxu0 %v1032_v9 }
 0x1b5   :  { %896 = vmatpush3.msra.mxu1 %v509_v45 }
 0x1b6   :  { %897 = vmatprep.subr.mxu1 %v524_v47 }
 0x1b7   :  { %898 = vmatpush3.msra.mxu1 %v508_v49 }
 0x1b8   :  { %899 = vmatprep.subr.mxu1 %v523_v51 }
 0x1b9   :  { %900 = vmatpush3.msra.mxu1 %v507_v53 }
 0x1ba   :  { %901 = vmatprep.subr.mxu1 %v522_v55  ;;  %v451_v55 = vsub.s32 0, %v1189_v37 }
 0x1bb   :  { %902 = vmatpush3.msra.mxu1 %v506_v57  ;;  %v456_v57 = vsub.s32 1, %v1189_v37 }
 0x1bc   :  { %903 = vmatprep.subr.mxu1 %v521_v59  ;;  %v452_v58 = vrot.slane %v1242_v56, %v451_v55 }
 0x1bd   :  { %904 = vmatpush3.msra.mxu1 %v505_v61  ;;  %v457_v61 = vrot.slane %v1242_v56, %v456_v57 }
 0x1be   :  { %905 = vmatprep.subr.mxu1 %v520_v63 }
 0x1bf   :  { %906 = vmatpush3.msra.mxu1 %v504_v2 }
 0x1c0   :  { %907 = vmatprep.subr.mxu1 %v519_v4 }
 0x1c1   :  { %908 = vmatpush3.msra.mxu1 %v503_v6  ;;  %v689_v6 = vld [vmem:[%s1328_s4 + $0x70] sm:$0xff] }
 0x1c2   :  { %909 = vmatprep.subr.mxu1 %v518_v8  ;;  %v687_v8 = vld [vmem:[%s1328_s4 + $0x60] sm:$0xff] }
 0x1c3   :  { %910 = vmatpush3.msra.mxu1 %v502_v11  ;;  %v685_v11 = vld [vmem:[%s1328_s4 + $0x50] sm:$0xff] }
 0x1c4   :  { %911 = vmatprep.subr.mxu1 %v517_v13  ;;  %v683_v13 = vld [vmem:[%s1328_s4 + $0x40] sm:$0xff] }
 0x1c5   :  { %912 = vmatpush3.msra.mxu1 %v501_v15  ;;  %v681_v15 = vld [vmem:[%s1328_s4 + $0x30] sm:$0xff] }
 0x1c6   :  { %913 = vmatprep.subr.mxu1 %v516_v17  ;;  %v679_v17 = vld [vmem:[%s1328_s4 + $0x20] sm:$0xff] }
 0x1c7   :  { %914 = vmatpush3.msra.mxu1 %v500_v19  ;;  %v677_v19 = vld [vmem:[%s1328_s4 + $0x10] sm:$0xff] }
 0x1c8   :  { %915 = vmatprep.subr.mxu1 %v515_v21  ;;  %v675_v21 = vld [vmem:[%s1328_s4] sm:$0xff] }
 0x1c9   :  { %916 = vmatpush3.msra.mxu1 %v499_v23 }
 0x26a   :  { %v844_v24 = vpop.f32.mrf.mxu1 }
 0x26c   :  { %v845_v25 = vpop.f32.mrf.mxu1 }
 0x26d   :  { %v846_v29 = vadd.f32 %v845_v25, %v844_v24  ;;  %v534_v25 = vrot.slane %v1242_v56, %v533_v22 }
 0x26e   :  { %v847_v27 = vpop.f32.mrf.mxu1 }
 0x270   :  { %v848_v28 = vpop.f32.mrf.mxu1 }
 0x271   :  { %v849_v30 = vadd.f32 %v848_v28, %v847_v27 }
 0x273   :  { %v420_v32 = vmax.f32 %v846_v29, %v849_v30 }
 0x275   :  { %v425_v33 = vadd.f32 %v424_v31, %v420_v32  ;;  %v693_v32 = vsub.s32 3, %v1189_v37 }
 0x277   :  { %vm426_vm9 = vcmp.gt.f32.partialorder %v425_v33, 0.0  ;;  %v427_v34 = vmul.f32 0.2, %v425_v33 }
 0x279   :  { %v428_v35 = vsel %vm426_vm9, %v425_v33, %v427_v34  ;;  %v694_v33 = vrot.slane %v1242_v56, %v693_v32 }
 0x27a   :  { %v429_v36 = vrot.slane %v428_v35, 4 }
 0x27c   :  { %v430_v38 = vadd.f32 %v429_v36, %v428_v35  ;;  %v769_v36 = vrot.slane %v1242_v56, %v184_v42 }
 0x27e   :  { %v431_v39 = vrot.slane %v430_v38, 2 }
 0x280   :  { %v432_v40 = vadd.f32 %v431_v39, %v430_v38 }
 0x282   :  { %v433_v41 = vrot.slane %v432_v40, 1 }
 0x284   :  { %v434_v44 = vadd.f32 %v433_v41, %v432_v40  ;;  %v778_v41 = vrot.slane %v1242_v56, %v248_v43 }
 0x286   :  { %v436_v45 = vmul.f32 0.125, %v434_v44 }
 0x288   :  { %v437_v46 = vsub.f32 %v428_v35, %v436_v45 }
 0x28a   :  { %v438_v47 = vmul.f32 %v437_v46, %v437_v46 }
 0x28c   :  { %v439_v48 = vrot.slane %v438_v47, 4 }
 0x28e   :  { %v440_v49 = vadd.f32 %v439_v48, %v438_v47 }
 0x290   :  { %v441_v50 = vrot.slane %v440_v49, 2 }
 0x292   :  { %v442_v51 = vadd.f32 %v441_v50, %v440_v49 }
 0x294   :  { %v443_v52 = vrot.slane %v442_v51, 1 }
 0x296   :  { %v444_v0 = vadd.f32 %v443_v52, %v442_v51 }
 0x298   :  { %v445_v53 = vmul.f32 0.125, %v444_v0 }
 0x29a   :  { %v446_v54 = vadd.f32 1e-05, %v445_v53 }
 0x29c   :  { %999 = vrsqrt.f32 %v446_v54 }
 0x2a9   :  { %v1000_v59 = vpop.eup %999 }
 0x2aa   :  { %v448_v60 = vmul.f32 %v1000_v59, %v437_v46 }
 0x2ac   :  { %v453_v62 = vmul.f32 %v452_v58, %v448_v60 }
 0x2ae   :  { %v458_v63 = vadd.f32 %v457_v61, %v453_v62 }
 0x2b0   :  { %459 = vst [vmem:[#allocation3] sm:$0xff] %v458_v63 }
 0x2b7   :  { %v462_v2 = vld [vmem:[#allocation3 + $0x1] ss:$4 sm:$0x3]  ;;  %v466_v3 = vld [vmem:[#allocation3 + $0x3] ss:$4 sm:$0x3] }
 0x2b8   :  { %599 = vmatprep.mubr.f32.mxu0 %v462_v2  ;;  %669 = vmatprep.mubr.f32.mxu1 %v466_v3  ;;  %v460_v4 = vld [vmem:[#allocation3] ss:$4 sm:$0x3]  ;;  %v464_v5 = vld [vmem:[#allocation3 + $0x2] ss:$4 sm:$0x3] }
 0x2b9   :  { %600 = vmatmul.mubr.f32.vlgmr.msra.gmra.mxu0 %v460_v4  ;;  %670 = vmatmul.mubr.f32.vlgmr.msra.gmra.mxu1 %v464_v5 }
 0x2ba   :  { %952 = vmatpush3.msra.mxu0 %v690_v1  ;;  %983 = vmatprep.mubr.msk.f32.mxu0 %vm1034_vm10, %v1032_v9 }
 0x2bb   :  { %953 = vmatprep.subr.mxu0 %v1032_v9 }
 0x2bc   :  { %954 = vmatpush3.msra.mxu0 %v689_v6 }
 0x2bd   :  { %955 = vmatprep.subr.mxu0 %v1032_v9 }
 0x2be   :  { %956 = vmatpush3.msra.mxu0 %v688_v7 }
 0x2bf   :  { %957 = vmatprep.subr.mxu0 %v1032_v9 }
 0x2c0   :  { %958 = vmatpush3.msra.mxu0 %v687_v8 }
 0x2c1   :  { %959 = vmatprep.subr.mxu0 %v1032_v9 }
 0x2c2   :  { %960 = vmatpush3.msra.mxu0 %v686_v10 }
 0x2c3   :  { %961 = vmatprep.subr.mxu0 %v1032_v9 }
 0x2c4   :  { %962 = vmatpush3.msra.mxu0 %v685_v11 }
 0x2c5   :  { %963 = vmatprep.subr.mxu0 %v1032_v9 }
 0x2c6   :  { %964 = vmatpush3.msra.mxu0 %v684_v12 }
 0x2c7   :  { %965 = vmatprep.subr.mxu0 %v1032_v9 }
 0x2c8   :  { %966 = vmatpush3.msra.mxu0 %v683_v13 }
 0x2c9   :  { %967 = vmatprep.subr.mxu0 %v1032_v9 }
 0x2ca   :  { %968 = vmatpush3.msra.mxu0 %v682_v14 }
 0x2cb   :  { %969 = vmatprep.subr.mxu0 %v1032_v9 }
 0x2cc   :  { %970 = vmatpush3.msra.mxu0 %v681_v15 }
 0x2cd   :  { %971 = vmatprep.subr.mxu0 %v1032_v9 }
 0x2ce   :  { %972 = vmatpush3.msra.mxu0 %v680_v16 }
 0x2cf   :  { %973 = vmatprep.subr.mxu0 %v1032_v9 }
 0x2d0   :  { %974 = vmatpush3.msra.mxu0 %v679_v17 }
 0x2d1   :  { %975 = vmatprep.subr.mxu0 %v1032_v9 }
 0x2d2   :  { %976 = vmatpush3.msra.mxu0 %v678_v18 }
 0x2d3   :  { %977 = vmatprep.subr.mxu0 %v1032_v9 }
 0x2d4   :  { %978 = vmatpush3.msra.mxu0 %v677_v19 }
 0x2d5   :  { %979 = vmatprep.subr.mxu0 %v1032_v9 }
 0x2d6   :  { %980 = vmatpush3.msra.mxu0 %v676_v20 }
 0x2d7   :  { %981 = vmatprep.subr.mxu0 %v1032_v9 }
 0x2d8   :  { %982 = vmatpush3.msra.mxu0 %v675_v21 }
 0x379   :  { %v882_v23 = vpop.f32.mrf.mxu0  ;;  %v917_v24 = vpop.f32.mrf.mxu1 }
 0x37b   :  { %v883_v26 = vpop.f32.mrf.mxu0  ;;  %v918_v27 = vpop.f32.mrf.mxu1 }
 0x37c   :  { %v884_v28 = vadd.f32 %v883_v26, %v882_v23  ;;  %v919_v30 = vadd.f32 %v918_v27, %v917_v24 }
 0x37e   :  { %v602_v29 = vadd.f32 %v884_v28, %v534_v25 }
 0x380   :  { %v672_v31 = vadd.f32 %v919_v30, %v602_v29 }
 0x382   :  { %984 = vmatmul.mubr.f32.vlgmr.msra.gmra.mxu0 %v672_v31 }
 0x442   :  { %v761_v34 = vpop.f32.mrf.mxu0 }
 0x443   :  { %v762_v9 = vadd.f32 %v761_v34, %v694_v33 }
 0x444   :  { %v985_v35 = vpop.f32.mrf.mxu0 }
 0x445   :  { %1001 = vtanh.f32 %v762_v9 }
 0x452   :  { %v1002_v38 = vpop.eup %1001 }
 0x453   :  { %v770_v39 = vmul.f32 %v1002_v38, %v769_v36 }
 0x455   :  { %v772_v40 = vsel %vm771_vm11, %v770_v39, 0.0 }
 0x456   :  { %773 = vadd.xlane.f32.xlu1 %v772_v40 }
 0x4df   :  { %v774_v44 = vpop.xlane.xlu1 %773 }
 0x4e0   :  { %v779_v45 = vadd.f32 %v778_v41, %v774_v44 }
 0x4e2   :  { %v802_v46 = vmul.f32 -1.442695, %v779_v45 }
 0x4e4   :  { %1003 = vpow2.f32 %v802_v46 }
 0x4f1   :  { %v1004_v47 = vpop.eup %1003 }
 0x4f2   :  { %v783_v48 = vadd.f32 1.0, %v1004_v47 }
 0x4f4   :  { %1005 = vrcp.f32 %v783_v48 }
 0x501   :  { %v1006_v49 = vpop.eup %1005 }
 0x502   :  { %787 = vst.msk [vmem:[%s1329_s5] sm:$0x3] %vm786_vm12, %v1006_v49 }
 0x503   :  { %792 = vsyncpa [#allocation5], 1 }

</bundles_post_ra>
